<compile_context>
chip_gen: v5e
topology: v5e:2x2
jax: 0.10.0
libtpu: 0.0.40
codegen_flags: <defaults>
</compile_context>

<pallas_src>
import functools

import numpy as np
import jax
import jax.numpy as jnp
from jax import lax
from jax.experimental import pallas as pl
from jax.experimental.pallas import tpu as pltpu

_EPS = 1e-12                    # guards zero-norm frames / zero padding rows
_LANE = 128
_SUBLANE = 8
_TARGET_TILE_BYTES = 1 << 20    # ~1 MiB of streamed bf16 frame bytes per tile
_MAX_TILE_T = 4096
_VMEM_LIMIT = 32 * 1024 * 1024


def _round_up(a, b):
    return ((a + b - 1) // b) * b


def _choose_tile_t(n_frames, d):
    # Size the tile by bytes (bf16 frames), capped at 4096 rows; short clips
    # use a single tile rounded up to the sublane granule.
    rows = _TARGET_TILE_BYTES // max(d * 2, 1)
    rows = max(_SUBLANE, min(_MAX_TILE_T, (rows // _SUBLANE) * _SUBLANE))
    if n_frames <= rows:
        return _round_up(max(n_frames, 1), _SUBLANE)
    return rows


# --------------------------------------------------------------------------
# Kernel 1: per-frame cosine similarities + per-tile partial frame sums
# --------------------------------------------------------------------------
def _frame_sim_kernel(x_ref, sup_ref, frame_sim_ref, psum_ref):
    x = x_ref[...]                                    # (TILE_T, D) bf16
    sup = sup_ref[...]                                # (C_pad, D) bf16, rows ~unit
    xf = x.astype(jnp.float32)

    # per-frame inverse norm accumulated in f32 (rsqrt -> EUP slot)
    inv = lax.rsqrt(jnp.sum(xf * xf, axis=-1, keepdims=True) + _EPS)   # (TILE_T, 1)

    # bf16 frames straight into the MXU (contract last dims, no transpose);
    # normalize the (TILE_T, C_pad) similarity afterwards instead of x/||x||.
    s = lax.dot_general(x, sup, (((1,), (1,)), ((), ())),
                        preferred_element_type=jnp.float32)            # (TILE_T, C_pad)
    frame_sim_ref[...] = (s * inv).astype(frame_sim_ref.dtype)         # bf16 writeback

    # Per-tile partial frame sum kept as 8 sublane partials: pure VALU vreg
    # adds, the final 8 -> 1 collapse happens once in the XLA epilogue.
    tile_t, d = xf.shape
    partial = jnp.sum(xf.reshape(tile_t // _SUBLANE, _SUBLANE, d), axis=0)  # (8, D)
    psum_ref[...] = partial.reshape(psum_ref.shape)


def frame_similarity(x_pad, support_bf16, tile_t):
    t_pad, d = x_pad.shape
    c_pad = support_bf16.shape[0]
    n_tiles = t_pad // tile_t
    return pl.pallas_call(
        _frame_sim_kernel,
        grid=(n_tiles,),
        in_specs=[
            pl.BlockSpec((tile_t, d), lambda i: (i, 0)),    # streamed bf16 frames
            pl.BlockSpec((c_pad, d), lambda i: (0, 0)),     # resident prototypes
        ],
        out_specs=(
            pl.BlockSpec((tile_t, c_pad), lambda i: (i, 0)),
            pl.BlockSpec((1, _SUBLANE, d), lambda i: (i, 0, 0)),
        ),
        out_shape=(
            jax.ShapeDtypeStruct((t_pad, c_pad), jnp.bfloat16),          # frame_sim
            jax.ShapeDtypeStruct((n_tiles, _SUBLANE, d), jnp.float32),   # partial sums
        ),
        compiler_params=pltpu.CompilerParams(
            dimension_semantics=("parallel",),          # no cross-step state
            vmem_limit_bytes=_VMEM_LIMIT),
    )(x_pad, support_bf16)


@functools.partial(jax.jit, static_argnames=("n_frames", "n_classes", "tile_t"))
def fused_similarity_path(x_pad, support_bf16, support_f32, n_frames, n_classes,
                          tile_t):
    """One dispatch: streaming Pallas kernel + tiny mean/argmax/column epilogue."""
    frame_sim, psum = frame_similarity(x_pad, support_bf16, tile_t)

    total = jnp.sum(psum, axis=(0, 1))                           # (D,) f32
    mean = total * jnp.float32(1.0 / n_frames)
    mean_n = mean * lax.rsqrt(jnp.sum(mean * mean) + _EPS)
    mean_sim = support_f32 @ mean_n                              # (C_pad,)

    col_ids = jnp.arange(mean_sim.shape[0])
    masked = jnp.where(col_ids < n_classes, mean_sim, -jnp.inf)
    max_idx = jnp.argmax(masked).astype(jnp.int32)               # first-match, as torch

    # Device-side column gather: only a (n_frames,) f32 vector crosses D2H.
    col = lax.dynamic_slice_in_dim(frame_sim, max_idx, 1, axis=1)
    col = col[:n_frames, 0].astype(jnp.float32)
    return col, mean_sim, max_idx


# --------------------------------------------------------------------------
# Kernel 2: per-tile partial segment sums over covered frame tiles only
# --------------------------------------------------------------------------
def _segment_partial_kernel(tile_ids_ref, starts_ref, ends_ref, x_ref, psum_ref,
                            *, tile_t):
    j = pl.program_id(0)
    base = tile_ids_ref[j] * tile_t                   # first global frame of tile
    s_pad = starts_ref.shape[0]
    # global frame index of each (segment-row, local-frame) pair in this tile
    f = base + lax.broadcasted_iota(jnp.int32, (s_pad, tile_t), 1)
    inside = (f >= starts_ref[...]) & (f < ends_ref[...])        # [start, end) as torch
    w = jnp.where(inside, 1.0, 0.0).astype(x_ref.dtype)          # bf16 0/1 indicator
    # partial segment sums on the MXU: (S_pad, TILE_T) @ (TILE_T, D)
    part = lax.dot_general(w, x_ref[...], (((1,), (0,)), ((), ())),
                           preferred_element_type=jnp.float32)   # (S_pad, D)
    psum_ref[...] = part.reshape(psum_ref.shape)


def segment_partial_sums(tile_ids, starts, ends, x_pad, tile_t):
    t_pad, d = x_pad.shape
    s_pad = starts.shape[0]
    n_cov = tile_ids.shape[0]
    kernel = functools.partial(_segment_partial_kernel, tile_t=tile_t)
    return pl.pallas_call(
        kernel,
        grid_spec=pltpu.PrefetchScalarGridSpec(
            num_scalar_prefetch=1,                    # tile_ids -> SMEM
            grid=(n_cov,),
            in_specs=[
                pl.BlockSpec((s_pad, 1), lambda j, tids: (0, 0)),          # starts
                pl.BlockSpec((s_pad, 1), lambda j, tids: (0, 0)),          # ends
                pl.BlockSpec((tile_t, d), lambda j, tids: (tids[j], 0)),   # covered tile
            ],
            out_specs=pl.BlockSpec((1, s_pad, d), lambda j, tids: (j, 0, 0)),
        ),
        out_shape=jax.ShapeDtypeStruct((n_cov, s_pad, d), jnp.float32),
        compiler_params=pltpu.CompilerParams(
            dimension_semantics=("parallel",),
            vmem_limit_bytes=_VMEM_LIMIT),
    )(tile_ids, starts, ends, x_pad)


@functools.partial(jax.jit, static_argnames=("tile_t",))
def segment_score_path(tile_ids, starts, ends, x_pad, support_f32, tile_t):
    partials = segment_partial_sums(tile_ids, starts, ends, x_pad, tile_t)
    seg_sum = jnp.sum(partials, axis=0)                          # (S_pad, D)
    # normalizing the sum == normalizing the mean (positive scale), so the
    # torch mean -> normalize -> matmul scores are reproduced.
    seg_n = seg_sum * lax.rsqrt(jnp.sum(seg_sum * seg_sum, axis=-1,
                                        keepdims=True) + _EPS)
    return seg_n @ support_f32.T                                 # (S_pad, C_pad)


# --------------------------------------------------------------------------
# T3ALNet (zero-shot temporal action localization head)
# --------------------------------------------------------------------------
class T3ALNetPallas:
    def __init__(self, support_features, stride=1, dataset="thumos", m=0.7):
        # support_features plays the role of self.support_videos_features_tensor.
        sf = jnp.asarray(support_features, dtype=jnp.float32)
        norms = jnp.linalg.norm(sf, axis=1, keepdims=True)
        sf = sf / jnp.maximum(norms, 1e-12)          # normalized ONCE, eps-guarded
        self.num_classes = int(sf.shape[0])
        self.feat_dim = int(sf.shape[1])
        # zero-pad the class dim to a lane-dense 128 so every similarity write is
        # a full (8,128) vreg store; padded rows give 0 similarity and are masked
        # out of the argmax / sliced away on the host.
        self.c_pad = _round_up(max(self.num_classes, 1), _LANE)
        pad = ((0, self.c_pad - self.num_classes), (0, 0))
        self.support_f32 = jnp.pad(sf, pad)                        # tiny XLA epilogues
        self.support_bf16 = self.support_f32.astype(jnp.bfloat16)  # streamed in kernels
        self.stride = stride
        self.dataset = dataset
        self.m = m

    def _pad_frames(self, video_embeddings):
        t = int(video_embeddings.shape[0])
        tile_t = _choose_tile_t(t, self.feat_dim)
        t_pad = _round_up(t, tile_t)
        x_pad = jnp.pad(video_embeddings.astype(jnp.bfloat16),
                        ((0, t_pad - t), (0, 0)))
        return x_pad, tile_t

    def select_segments(self, similarity_np):
        # Exact port of the PyTorch select_segments (host-side sequential loop).
        if self.dataset == "thumos":
            mask = similarity_np > similarity_np.mean()
        elif self.dataset == "anet":
            mask = similarity_np > self.m
        else:
            raise ValueError(f"Not implemented dataset: {self.dataset}")
        selected = np.nonzero(mask)[0]
        segments = []
        # torch.nonzero(...).squeeze() becomes 0-dim when a single index is
        # selected, failing the `dim() > 0` check -> require >= 2 indices.
        if selected.size >= 2:
            interval_start = selected[0]
            for i in range(1, len(selected)):
                if selected[i] <= selected[i - 1] + self.stride:
                    continue
                else:
                    interval_end = selected[i - 1]
                    if interval_start != interval_end:
                        segments.append([int(interval_start), int(interval_end)])
                    interval_start = selected[i]
            if interval_start != selected[-1]:
                segments.append([int(interval_start), int(selected[-1])])
        return segments

    def _segment_arrays(self, segments, tile_t):
        s = len(segments)
        s_pad = _round_up(s, _SUBLANE)
        starts = np.zeros((s_pad, 1), dtype=np.int32)
        ends = np.zeros((s_pad, 1), dtype=np.int32)     # padded rows: empty segments
        covered = set()
        for i, (a, b) in enumerate(segments):           # frames [a, b) as torch slice
            starts[i, 0] = a
            ends[i, 0] = b
            covered.update(range(a // tile_t, (b - 1) // tile_t + 1))
        tile_ids = np.asarray(sorted(covered), dtype=np.int32)
        return jnp.asarray(tile_ids), jnp.asarray(starts), jnp.asarray(ends)

    def forward(self, x):
        idx, video_name, video_embeddings = x
        video_name = video_name[0]
        ve = jnp.squeeze(video_embeddings, axis=0)                # (T, D)
        t = int(ve.shape[0])
        x_pad, tile_t = self._pad_frames(ve)

        # Hot path #1: one jitted dispatch -> selected-class column, mean sims,
        # argmax.  D2H is only a (T,) f32 vector + one scalar.
        col, _mean_sim, max_idx_dev = fused_similarity_path(
            x_pad, self.support_bf16, self.support_f32, t, self.num_classes, tile_t)
        max_idx = int(max_idx_dev)
        similarities = np.asarray(col)                            # (T,)

        segments = self.select_segments(similarities)

        # TODO(synk): get_video_fps / get_segments_gt need video files + annotation
        # JSON (file I/O) -> no Pallas equivalent; gt_mask left zero.
        pred_mask = np.zeros((t,), dtype=np.float32)
        gt_mask = np.zeros((t,), dtype=np.float32)
        unique_labels = set()

        if segments:
            s = len(segments)
            tile_ids, starts, ends = self._segment_arrays(segments, tile_t)
            # Hot path #2: stream only the covered frame tiles; scores are the
            # full per-class row per segment, exactly like torch's scores[i].
            scores = segment_score_path(tile_ids, starts, ends, x_pad,
                                        self.support_f32, tile_t)
            scores_np = np.asarray(scores)[:s, :self.num_classes]

            for seg_s, seg_e in segments:
                pred_mask[seg_s:seg_e] = 1.0
            output = [
                {"label": max_idx, "score": scores_np[i], "segment": segments[i]}
                for i in range(s)
            ]
        else:
            output = [{"label": -1, "score": 0, "segment": []}]

        return (video_name, output, jnp.asarray(pred_mask), jnp.asarray(gt_mask),
                unique_labels, None)


# --------------------------------------------------------------------------
if __name__ == "__main__":
    key = jax.random.PRNGKey(0)
    k_vid, k_sup = jax.random.split(key)

    T, D, C = 16, 128, 8   # frames, embedding dim, number of zero-shot classes

    # Batched video embeddings (batch of 1, like the dataloader): (1, T, D)
    video_embeddings = jax.random.normal(k_vid, (1, T, D), dtype=jnp.float32)
    # Deterministic synthetic class-average features: (C, D)
    support_features = jax.random.normal(k_sup, (C, D), dtype=jnp.float32)

    net = T3ALNetPallas(support_features, stride=1, dataset="thumos")

    # --- full forward pass -------------------------------------------------
    x = (0, ["video_test_0000000"], video_embeddings)
    video_name, output, pred_mask, gt_mask, unique_labels, _ = net.forward(x)
    jax.block_until_ready(pred_mask)
    jax.block_until_ready(gt_mask)

    # --- correctness checks against a NumPy (f32) reference ----------------
    ve_np = np.asarray(video_embeddings, dtype=np.float32)[0]
    sup_np = np.asarray(support_features, dtype=np.float32)
    sup_np = sup_np / np.linalg.norm(sup_np, axis=1, keepdims=True)
    xn_np = ve_np / np.linalg.norm(ve_np, axis=1, keepdims=True)
    ref_frame = xn_np @ sup_np.T
    xm_np = ve_np.mean(axis=0, keepdims=True)
    xm_np = xm_np / np.linalg.norm(xm_np, axis=1, keepdims=True)
    ref_mean = (xm_np @ sup_np.T)[0]

    x_pad, tile_t = net._pad_frames(jnp.squeeze(video_embeddings, axis=0))

    # raw Pallas kernel 1 (bf16 streaming, bf16 frame_sim output)
    frame_sim, psum = frame_similarity(x_pad, net.support_bf16, tile_t)
    frame_sim_np = np.asarray(frame_sim).astype(np.float32)
    assert np.allclose(frame_sim_np[:T, :C], ref_frame, atol=2e-2)
    assert np.allclose(np.asarray(psum).sum(axis=(0, 1)), ve_np.sum(axis=0), atol=0.25)

    # fused jit path (epilogue + argmax + device-side column gather)
    col, mean_sim, idx_dev = fused_similarity_path(
        x_pad, net.support_bf16, net.support_f32, T, C, tile_t)
    max_idx = int(idx_dev)
    assert np.allclose(np.asarray(mean_sim)[:C], ref_mean, atol=5e-2)
    assert ref_mean[max_idx] >= ref_mean.max() - 5e-2
    assert np.allclose(np.asarray(col), ref_frame[:, max_idx], atol=2e-2)

    # always exercise the segment-scoring kernel (forward may find no segments)
    segments = [[0, 4], [5, 9]]
    tile_ids, starts, ends = net._segment_arrays(segments, tile_t)
    scores = segment_score_path(tile_ids, starts, ends, x_pad,
                                net.support_f32, tile_t)
    seg_ref = np.stack([ve_np[0:4].mean(axis=0), ve_np[5:9].mean(axis=0)])
    seg_ref = seg_ref / np.linalg.norm(seg_ref, axis=1, keepdims=True)
    ref_sc = seg_ref @ sup_np.T
    assert np.allclose(np.asarray(scores)[:2, :C], ref_sc, atol=3e-2)

    jax.block_until_ready(scores)
    print("KERNEL_OK")
</pallas_src>

<mosaic_0001>
module attributes {stable_mosaic.version = 11 : i64} {
  func.func @_frame_sim_kernel(%arg0: i32, %arg1: memref<16x128xbf16, #tpu.memory_space<vmem>>, %arg2: memref<128x128xbf16, #tpu.memory_space<vmem>>, %arg3: memref<16x128xbf16, #tpu.memory_space<vmem>>, %arg4: memref<1x8x128xf32, #tpu.memory_space<vmem>>) attributes {dimension_semantics = [#tpu.dimension_semantics<parallel>], iteration_bounds = array<i64: 1>, scalar_prefetch = 0 : i64, scratch_operands = 0 : i64, tpu.core_type = #tpu.core_type<tc>, window_params = [{transform_indices = @transform_0, window_bounds = array<i64: 16, 128>}, {pipeline_mode = #tpu.pipeline_mode<synchronous>, transform_indices = @transform_1, window_bounds = array<i64: 128, 128>}, {transform_indices = @transform_2, window_bounds = array<i64: 16, 128>}, {transform_indices = @transform_3, window_bounds = array<i64: 1, 8, 128>}]} {
    %c0 = arith.constant 0 : index
    %c0_0 = arith.constant 0 : index
    %0 = vector.load %arg1[%c0, %c0_0] : memref<16x128xbf16, #tpu.memory_space<vmem>>, vector<16x128xbf16>
    %c0_1 = arith.constant 0 : index
    %c0_2 = arith.constant 0 : index
    %1 = vector.load %arg2[%c0_1, %c0_2] : memref<128x128xbf16, #tpu.memory_space<vmem>>, vector<128x128xbf16>
    %2 = arith.extf %0 : vector<16x128xbf16> to vector<16x128xf32>
    %3 = arith.mulf %2, %2 : vector<16x128xf32>
    %cst = arith.constant dense<0.000000e+00> : vector<16xf32>
    %4 = vector.multi_reduction <add>, %3, %cst [1] : vector<16x128xf32> to vector<16xf32>
    %5 = vector.shape_cast %4 : vector<16xf32> to vector<16x1xf32>
    %cst_3 = arith.constant 9.99999996E-13 : f32
    %6 = vector.broadcast %cst_3 : f32 to vector<16x1xf32>
    %7 = arith.addf %5, %6 : vector<16x1xf32>
    %8 = math.rsqrt %7 : vector<16x1xf32>
    %cst_4 = arith.constant dense<0.000000e+00> : vector<16x128xf32>
    %9 = tpu.matmul %0, %1, %cst_4 {dimension_numbers = #tpu.dot_dimension_numbers<[1], [1], [0], [0], [0, 0, 1, 0], [], []>} : vector<16x128xbf16>, vector<128x128xbf16>, vector<16x128xf32> -> vector<16x128xf32>
    %10 = vector.broadcast %8 : vector<16x1xf32> to vector<16x128xf32>
    %11 = arith.mulf %9, %10 : vector<16x128xf32>
    %12 = arith.truncf %11 : vector<16x128xf32> to vector<16x128xbf16>
    %c0_5 = arith.constant 0 : index
    %c0_6 = arith.constant 0 : index
    %13 = vector.load %arg3[%c0_5, %c0_6] : memref<16x128xbf16, #tpu.memory_space<vmem>>, vector<16x128xbf16>
    tpu.vector_store %arg3[%c0_5, %c0_6], %12 {strides = array<i32>} : memref<16x128xbf16, #tpu.memory_space<vmem>>, vector<16x128xbf16>,
    %14 = vector.shape_cast %2 : vector<16x128xf32> to vector<2x8x128xf32>
    %cst_7 = arith.constant dense<0.000000e+00> : vector<8x128xf32>
    %15 = vector.multi_reduction <add>, %14, %cst_7 [0] : vector<2x8x128xf32> to vector<8x128xf32>
    %16 = vector.shape_cast %15 : vector<8x128xf32> to vector<1x8x128xf32>
    %c0_8 = arith.constant 0 : index
    %c0_9 = arith.constant 0 : index
    %c0_10 = arith.constant 0 : index
    %17 = vector.load %arg4[%c0_8, %c0_9, %c0_10] : memref<1x8x128xf32, #tpu.memory_space<vmem>>, vector<1x8x128xf32>
    tpu.vector_store %arg4[%c0_8, %c0_9, %c0_10], %16 {strides = array<i32>} : memref<1x8x128xf32, #tpu.memory_space<vmem>>, vector<1x8x128xf32>,
    return
  }
  func.func @transform_0(%arg0: i32) -> (i32, i32) {
    %c0_i32 = arith.constant 0 : i32
    %c0_i32_0 = arith.constant 0 : i32
    return %arg0, %c0_i32 : i32, i32
  }
  func.func @transform_1(%arg0: i32) -> (i32, i32) {
    %c0_i32 = arith.constant 0 : i32
    %c0_i32_0 = arith.constant 0 : i32
    %c0_i32_1 = arith.constant 0 : i32
    return %c0_i32, %c0_i32_0 : i32, i32
  }
  func.func @transform_2(%arg0: i32) -> (i32, i32) {
    %c0_i32 = arith.constant 0 : i32
    %c0_i32_0 = arith.constant 0 : i32
    return %arg0, %c0_i32 : i32, i32
  }
  func.func @transform_3(%arg0: i32) -> (i32, i32, i32) {
    %c0_i32 = arith.constant 0 : i32
    %c0_i32_0 = arith.constant 0 : i32
    %c0_i32_1 = arith.constant 0 : i32
    return %arg0, %c0_i32, %c0_i32_0 : i32, i32, i32
  }
}

</mosaic_0001>

<bundles_post_ra>
// kernel: fused_similarity_path.1
= control target key start
LH: loop header
LB: loop body
LE: loop exit
PB: predicated region body
PF: predicated region fallthrough
CT: control target
= control target key end

     0   :  { %9 = vsyncpa [#allocation3], 0  ;;  %s325_s0 = inlined_call_operand.hbm [shape: bf16[16,128], index: 0, kind: input, shape index: {}]   ;;  %s326_s1 = inlined_call_operand.hbm [shape: bf16[128,128], index: 1, kind: input, shape index: {}]   ;;  %s327_s2 = inlined_call_operand.vmem [shape: bf16[16,128], index: 2, kind: output, shape index: {0}]   ;;  %s328_s3 = inlined_call_operand.vmem [shape: f32[1,8,128], index: 3, kind: output, shape index: {1}]  }
   0x1   :  { %s15_s14 = sshll.u32 %s325_s0, 4  ;;  %s16_s14 = int_to_ptr.hbm [resolvable:$true] %s15_s14 }
   0x2   :  { %10 = vsyncpa [#allocation5], 0  ;;  %s289_s15 = smov [#allocation2]   ;;  %s28_s19 = sshll.u32 %s326_s1, 4  ;;  %s29_s19 = int_to_ptr.hbm [resolvable:$true] %s28_s19 }
   0x3   :  { %s17_s16 = sshll.u32 %s289_s15, 4  ;;  %s290_s20 = smov 64   ;;  %s18_s16 = int_to_ptr.vmem [resolvable:$true] %s17_s16 }
   0x4   :  { %s291_s21 = smov 4   ;;  %s292_s22 = smov [#allocation4]  }
   0x5   :  { %23 = dma.hbm_to_vmem [thread:$0]  %s16_s14, 128, %s18_s16, [#allocation3], %s290_s20, %s290_s20, %s291_s21  }
   0x6   :  { %s30_s23 = sshll.u32 %s292_s22, 4  ;;  %s31_s23 = int_to_ptr.vmem [resolvable:$true] %s30_s23 }
   0x7   :  { %36 = dma.hbm_to_vmem [thread:$0]  %s29_s19, 1024, %s31_s23, [#allocation5], %s290_s20, %s290_s20, %s291_s21  }
   0x8   :  { %285 = dma.done.wait [#allocation3], 128  }
   0x9   :  { %286 = vsyncadd [#allocation3], 4294967168 }
   0xa   :  { %287 = dma.done.wait [#allocation5], 1024  }
   0xb   :  { %288 = vsyncadd [#allocation5], 4294966272  ;;  %v223_v0 = vld [vmem:[#allocation4 + $0x38] sm:$0xff]  ;;  %v222_v4 = vld [vmem:[#allocation4 + $0x30] sm:$0xff] }
   0xc   :  { %147 = vmatpush.bf16.xpose.msra.mxu0 %v223_v0  ;;  %v45_v1 = vld [vmem:[#allocation2] sm:$0xff]   ;;  %v221_v8 = vld [vmem:[#allocation4 + $0x28] sm:$0xff]  ;;  %v220_v9 = vld [vmem:[#allocation4 + $0x20] sm:$0xff] }
   0xd   :  { %v63_v2 = vunpack.c.l.bf16 %v45_v1  ;;  %v64_v5 = vunpack.c.h.bf16 %v45_v1  ;;  %v219_v10 = vld [vmem:[#allocation4 + $0x18] sm:$0xff]  ;;  %v218_v11 = vld [vmem:[#allocation4 + $0x10] sm:$0xff]  ;;  %v217_v12 = vld [vmem:[#allocation4 + $0x8] sm:$0xff] }
   0xe   :  { %v216_v13 = vld [vmem:[#allocation4] sm:$0xff]  ;;  %v215_v14 = vld [vmem:[#allocation2] sm:$0xff] }
   0xf   :  { %v65_v3 = vmul.f32 %v63_v2, %v63_v2  ;;  %v66_v6 = vmul.f32 %v64_v5, %v64_v5  ;;  %v167_v7 = vadd.f32 %v64_v5, %v63_v2 }
  0x11   :  { %67 = vadd.xlane.f32.xlu0 %v65_v3  ;;  %168 = vst [vmem:[%s328_s3] sm:$0xff] %v167_v7 }
  0x14   :  { %148 = vmatpush.bf16.xpose.msra.mxu0 %v222_v4 }
  0x19   :  { %69 = vadd.xlane.f32.xlu0 %v66_v6 }
  0x1c   :  { %149 = vmatpush.bf16.xpose.msra.mxu0 %v221_v8 }
  0x24   :  { %150 = vmatpush.bf16.xpose.msra.mxu0 %v220_v9 }
  0x2c   :  { %151 = vmatpush.bf16.xpose.msra.mxu0 %v219_v10 }
  0x34   :  { %152 = vmatpush.bf16.xpose.msra.mxu0 %v218_v11 }
  0x3c   :  { %153 = vmatpush.bf16.xpose.msra.mxu0 %v217_v12 }
  0x44   :  { %154 = vmatpush.bf16.xpose.msra.mxu0 %v216_v13 }
  0x4b   :  { %155 = vmatmul.bf16.vlgmr.msra.gmra.mxu0 %v215_v14 }
  0x84   :  { %v68_v15 = vpop.xlane.xlu0 %67 }
  0x85   :  { %v71_v17 = vadd.f32 1e-12, %v68_v15 }
  0x87   :  { %233 = vrsqrt.f32 %v71_v17  ;;  %vm79_vm0 = vweird.f32 %v71_v17 }
  0x8c   :  { %v70_v16 = vpop.xlane.xlu0 %69 }
  0x8d   :  { %v72_v18 = vadd.f32 1e-12, %v70_v16  ;;  %v234_v19 = vpop.eup %233 }
  0x8e   :  { %v74_v21 = vmul.f32 %v234_v19, %v71_v17  ;;  %vm80_vm1 = vweird.f32 %v234_v19 }
  0x8f   :  { %235 = vrsqrt.f32 %v72_v18  ;;  %vm89_vm2 = vweird.f32 %v72_v18  ;;  %vm81_vm4 = vmor %vm79_vm0, %vm80_vm1 }
  0x90   :  { %v75_v23 = vmul.f32 %v234_v19, %v74_v21 }
  0x92   :  { %v76_v25 = vmul.f32 0.5, %v75_v23 }
  0x94   :  { %v77_v28 = vsub.f32 1.5, %v76_v25 }
  0x95   :  { %v236_v20 = vpop.eup %235 }
  0x96   :  { %v84_v22 = vmul.f32 %v236_v20, %v72_v18  ;;  %vm90_vm3 = vweird.f32 %v236_v20  ;;  %v78_v30 = vmul.f32 %v234_v19, %v77_v28 }
  0x97   :  { %vm91_vm5 = vmor %vm89_vm2, %vm90_vm3 }
  0x98   :  { %v85_v24 = vmul.f32 %v236_v20, %v84_v22  ;;  %v82_v32 = vsel %vm81_vm4, %v234_v19, %v78_v30 }
  0x9a   :  { %v86_v26 = vmul.f32 0.5, %v85_v24 }
  0x9c   :  { %v87_v27 = vsub.f32 1.5, %v86_v26 }
  0x9e   :  { %v88_v31 = vmul.f32 %v236_v20, %v87_v27 }
  0xa0   :  { %v92_v33 = vsel %vm91_vm5, %v236_v20, %v88_v31 }
  0xc8   :  { %v156_v29 = vpop.f32.mrf.mxu0 }
  0xc9   :  { %v161_v35 = vmul.f32 %v156_v29, %v82_v32 }
  0xd0   :  { %v158_v34 = vpop.f32.mrf.mxu0 }
  0xd1   :  { %v162_v36 = vmul.f32 %v158_v34, %v92_v33 }
  0xd3   :  { %v227_v37 = vpack.c.bf16 %v162_v36, %v161_v35 }
  0xd5   :  { %228 = vst [vmem:[%s327_s2] sm:$0xff] %v227_v37  }
  0xd6   :  { %177 = vsyncpa [#allocation3], 1 }
  0xd7   :  { %178 = vsyncpa [#allocation5], 1 }

</bundles_post_ra>
